<compile_context>
chip_gen: v7x
topology: tpu7x:2x2x1
jax: 0.10.0
libtpu: 0.0.40
codegen_flags: <defaults>
</compile_context>

<pallas_src>
import jax
import jax.numpy as jnp
from jax import lax
from jax.experimental import pallas as pl
from jax.experimental.pallas import tpu as pltpu

BN_EPS = 1e-5
_MIB = 1024 * 1024


def stats_kernel(x_ref, w1_ref, sum_ref, sq_ref):
    """Pass 1: per-feature sum and sum-of-squares of h = x @ W1."""
    @pl.when(pl.program_id(1) == 0)
    def _():
        sum_ref[...] = jnp.zeros_like(sum_ref)
        sq_ref[...] = jnp.zeros_like(sq_ref)

    h = jnp.dot(x_ref[...], w1_ref[...], preferred_element_type=jnp.float32)
    # Two full-block writes (no sublane concat); the XLU axis-0 reductions
    # hide under the MXU matmul.
    sum_ref[...] += jnp.sum(h, axis=0, keepdims=True)[None]
    sq_ref[...] += jnp.sum(h * h, axis=0, keepdims=True)[None]


def fused_kernel(x_ref, w1_ref, ss_ref, w2_ref, o_ref):
    """Pass 2: h = x @ W1, fused BN (precomputed scale/shift) + ReLU, y @ W2."""
    h = jnp.dot(x_ref[...], w1_ref[...], preferred_element_type=jnp.float32)
    # ss_ref row 0 = gamma * rsqrt(var + eps), row 1 = beta - mean * scale
    y = jnp.maximum(h * ss_ref[0:1, :] + ss_ref[1:2, :], 0.0)
    out = jnp.dot(y.astype(w2_ref.dtype), w2_ref[...],
                  preferred_element_type=jnp.float32)
    o_ref[...] = out.astype(o_ref.dtype)


def _vmem_limit_bytes():
    """Generation-aware scoped-VMEM limit (conservative v7x fallback)."""
    cap = 64 * _MIB  # v7x per-TC VMEM (smallest of v5e/v6e/v7x)
    try:
        cap = int(pltpu.get_tpu_info().vmem_capacity_bytes)
    except Exception:
        pass
    cap = max(32 * _MIB, min(cap, 128 * _MIB))
    # Leave headroom for compiler scratch; cap well under v6e/v5e physical.
    return min(cap - 16 * _MIB, 100 * _MIB)


def _kernel_vmem_bytes(tb, Din, H, Dout_p, ci, oi):
    """Rough per-core VMEM footprint for a batch tile of `tb` rows."""
    x_in = 2 * tb * Din * ci                 # double-buffered activation tile
    w1 = Din * H * ci                        # Buffered(1)
    w2 = H * Dout_p * ci                     # Buffered(1)
    ss = 2 * H * 4
    out = 2 * tb * Dout_p * oi               # double-buffered output tile
    inter = tb * H * 4 + tb * H * ci         # f32 h + compute-dtype y temps
    stats_out = 4 * 4 * H                    # pass-1 resident sum/sumsq blocks
    pass1 = x_in + w1 + stats_out + 2 * tb * H * 4
    pass2 = x_in + w1 + w2 + ss + out + inter
    return max(pass1, pass2)


def _pick_batch_tile(B, Din, H, Dout_p, ci, oi, budget):
    """Largest MXU-friendly batch tile that fits the VMEM budget."""
    b8 = max(8, ((B + 7) // 8) * 8)
    for tb in (1024, 512, 256, 128, 64, 32, 16, 8):
        if tb > b8:            # don't pad the batch beyond the next tile size
            continue
        if _kernel_vmem_bytes(tb, Din, H, Dout_p, ci, oi) <= budget:
            return tb
    return 8


def projection_forward(x, w1, b1, gamma, beta, w2, *,
                       compute_dtype=jnp.bfloat16):
    # b1 is accepted for interface parity with nn.Linear(bias=True) but unused:
    # the bias cancels exactly under training-mode batch centering.
    # (It must be re-added if eval/running statistics were ever used.)
    del b1
    B, Din = x.shape
    H = w1.shape[1]
    Dout = w2.shape[1]

    out_dtype = x.dtype
    ci = jnp.dtype(compute_dtype).itemsize
    oi = jnp.dtype(out_dtype).itemsize

    # Lane-dense output: pad Dout to a multiple of 128 (slice only if needed).
    Dout_p = ((Dout + 127) // 128) * 128

    vmem_limit = _vmem_limit_bytes()
    budget = int(0.6 * vmem_limit)
    tb = _pick_batch_tile(B, Din, H, Dout_p, ci, oi, budget)

    # Pad the batch up to a tile multiple; zero rows contribute exactly 0 to
    # the BN sums (no bias inside the kernel) and are sliced off afterwards.
    B_p = ((B + tb - 1) // tb) * tb
    nbt = B_p // tb
    nsplit = 2 if (nbt >= 2 and nbt % 2 == 0) else 1
    nbt_in = nbt // nsplit

    # Cast to the MXU compute dtype once (f32 accumulation inside the kernels).
    xc = x.astype(compute_dtype)
    if B_p != B:
        xc = jnp.pad(xc, ((0, B_p - B), (0, 0)))
    w1c = w1.astype(compute_dtype)
    w2c = w2.astype(compute_dtype)
    if Dout_p != Dout:
        w2c = jnp.pad(w2c, ((0, 0), (0, Dout_p - Dout)))

    f32 = 4

    # ---- Pass 1: batch statistics of h = x @ W1 (per-split accumulators) ----
    hsum, hsq = pl.pallas_call(
        stats_kernel,
        out_shape=(jax.ShapeDtypeStruct((nsplit, 1, H), jnp.float32),
                   jax.ShapeDtypeStruct((nsplit, 1, H), jnp.float32)),
        grid_spec=pltpu.PrefetchScalarGridSpec(
            num_scalar_prefetch=0,
            grid=(nsplit, nbt_in),
            in_specs=[
                pl.BlockSpec((tb, Din), lambda s, b: (s * nbt_in + b, 0)),
                pl.BlockSpec((Din, H), lambda s, b: (0, 0),
                             pipeline_mode=pl.Buffered(1)),
            ],
            out_specs=[
                pl.BlockSpec((1, 1, H), lambda s, b: (s, 0, 0)),
                pl.BlockSpec((1, 1, H), lambda s, b: (s, 0, 0)),
            ],
        ),
        compiler_params=pltpu.CompilerParams(
            dimension_semantics=("parallel", "arbitrary"),
            vmem_limit_bytes=vmem_limit,
        ),
        cost_estimate=pl.CostEstimate(
            flops=2 * B_p * Din * H + 3 * B_p * H,
            transcendentals=0,
            bytes_accessed=ci * (B_p * Din + Din * H) + f32 * 2 * nsplit * H,
        ),
    )(xc, w1c)

    # Finalize BN statistics (tiny (H,) math); fold gamma into the scale.
    mean = jnp.sum(hsum, axis=0)[0] / B            # divide by the *real* batch
    ex2 = jnp.sum(hsq, axis=0)[0] / B
    var = jnp.maximum(ex2 - mean * mean, 0.0)      # biased (training) variance
    scale = gamma * lax.rsqrt(var + BN_EPS)
    shift = beta - mean * scale
    ss = jnp.stack([scale, shift], axis=0).astype(jnp.float32)  # packed (2, H)

    # ---- Pass 2: normalize + ReLU + second matmul, parallel over B tiles ----
    out_p = pl.pallas_call(
        fused_kernel,
        out_shape=jax.ShapeDtypeStruct((B_p, Dout_p), out_dtype),
        grid_spec=pltpu.PrefetchScalarGridSpec(
            num_scalar_prefetch=0,
            grid=(nbt,),
            in_specs=[
                pl.BlockSpec((tb, Din), lambda b: (b, 0)),
                pl.BlockSpec((Din, H), lambda b: (0, 0),
                             pipeline_mode=pl.Buffered(1)),
                pl.BlockSpec((2, H), lambda b: (0, 0),
                             pipeline_mode=pl.Buffered(1)),
                pl.BlockSpec((H, Dout_p), lambda b: (0, 0),
                             pipeline_mode=pl.Buffered(1)),
            ],
            out_specs=pl.BlockSpec((tb, Dout_p), lambda b: (b, 0)),
        ),
        compiler_params=pltpu.CompilerParams(
            dimension_semantics=("parallel",),
            vmem_limit_bytes=vmem_limit,
        ),
        cost_estimate=pl.CostEstimate(
            flops=2 * B_p * Din * H + 2 * B_p * H * Dout_p + 3 * B_p * H,
            transcendentals=0,
            bytes_accessed=(ci * (B_p * Din + Din * H + H * Dout_p)
                            + f32 * 2 * H + oi * B_p * Dout_p),
        ),
    )(xc, w1c, ss, w2c)

    # Slice only when padding was actually applied (no-op for 128-aligned Dout
    # and tile-aligned B).
    if B_p != B or Dout_p != Dout:
        out_p = out_p[:B, :Dout]
    return out_p


def reference_forward(x, w1, b1, gamma, beta, w2):
    h = x @ w1 + b1
    mean = jnp.mean(h, axis=0, keepdims=True)
    var = jnp.mean((h - mean) ** 2, axis=0, keepdims=True)
    h = (h - mean) / jnp.sqrt(var + BN_EPS) * gamma + beta
    h = jnp.maximum(h, 0.0)
    return h @ w2


if __name__ == "__main__":
    # Small shapes consistent with the module (input_dim/hidden_dim/output_dim)
    batch, input_dim, hidden_dim, output_dim = 8, 32, 32, 16

    key = jax.random.PRNGKey(0)
    kx, kw1, kb1, kw2 = jax.random.split(key, 4)

    x = jax.random.normal(kx, (batch, input_dim), dtype=jnp.float32)

    # Deterministic parameter init (PyTorch-style uniform bounds for linears)
    bound1 = 1.0 / (input_dim ** 0.5)
    w1 = jax.random.uniform(kw1, (input_dim, hidden_dim), jnp.float32, -bound1, bound1)
    b1 = jax.random.uniform(kb1, (hidden_dim,), jnp.float32, -bound1, bound1)
    gamma = jnp.ones((hidden_dim,), jnp.float32)   # BatchNorm1d weight
    beta = jnp.zeros((hidden_dim,), jnp.float32)   # BatchNorm1d bias
    bound2 = 1.0 / (hidden_dim ** 0.5)
    w2 = jax.random.uniform(kw2, (hidden_dim, output_dim), jnp.float32, -bound2, bound2)

    # --- exactness check: f32 compute path vs f32 reference ---
    out_f32 = jax.block_until_ready(
        projection_forward(x, w1, b1, gamma, beta, w2, compute_dtype=jnp.float32))
    ref = reference_forward(x, w1, b1, gamma, beta, w2)
    assert out_f32.shape == (batch, output_dim)
    assert jnp.allclose(out_f32, ref, atol=1e-4, rtol=1e-4), \
        float(jnp.max(jnp.abs(out_f32 - ref)))

    # --- default bf16-MXU path vs reference on bf16-quantized inputs ---
    out_bf = jax.block_until_ready(projection_forward(x, w1, b1, gamma, beta, w2))
    xq = x.astype(jnp.bfloat16).astype(jnp.float32)
    w1q = w1.astype(jnp.bfloat16).astype(jnp.float32)
    w2q = w2.astype(jnp.bfloat16).astype(jnp.float32)
    ref_bf = reference_forward(xq, w1q, b1, gamma, beta, w2q)
    assert out_bf.shape == (batch, output_dim)
    assert jnp.allclose(out_bf, ref_bf, atol=5e-2, rtol=5e-2), \
        float(jnp.max(jnp.abs(out_bf - ref_bf)))

    print("KERNEL_OK")
</pallas_src>

<mosaic_0001>
module attributes {stable_mosaic.version = 11 : i64} {
  func.func @stats_kernel(%arg0: i32, %arg1: i32, %arg2: memref<8x32xf32, #tpu.memory_space<vmem>>, %arg3: memref<32x32xf32, #tpu.memory_space<vmem>>, %arg4: memref<1x1x32xf32, #tpu.memory_space<vmem>>, %arg5: memref<1x1x32xf32, #tpu.memory_space<vmem>>) attributes {dimension_semantics = [#tpu.dimension_semantics<parallel>, #tpu.dimension_semantics<arbitrary>], iteration_bounds = array<i64: 1, 1>, scalar_prefetch = 0 : i64, scratch_operands = 0 : i64, tpu.core_type = #tpu.core_type<tc>, window_params = [{transform_indices = @transform_0, window_bounds = array<i64: 8, 32>}, {pipeline_mode = #tpu.pipeline_mode<synchronous>, transform_indices = @transform_1, window_bounds = array<i64: 32, 32>}, {transform_indices = @transform_2, window_bounds = array<i64: 1, 1, 32>}, {transform_indices = @transform_3, window_bounds = array<i64: 1, 1, 32>}]} {
    %c0_i32 = arith.constant 0 : i32
    %0 = arith.cmpi eq, %arg1, %c0_i32 : i32
    %1 = arith.extui %0 : i1 to i32
    %c0_i32_0 = arith.constant 0 : i32
    %2 = arith.cmpi ne, %1, %c0_i32_0 : i32
    scf.if %2 {
      %cst_18 = arith.constant 0.000000e+00 : f32
      %19 = vector.broadcast %cst_18 : f32 to vector<1x1x32xf32>
      %c0_19 = arith.constant 0 : index
      %c0_20 = arith.constant 0 : index
      %c0_21 = arith.constant 0 : index
      %20 = vector.load %arg4[%c0_19, %c0_20, %c0_21] : memref<1x1x32xf32, #tpu.memory_space<vmem>>, vector<1x1x32xf32>
      tpu.vector_store %arg4[%c0_19, %c0_20, %c0_21], %19 {strides = array<i32>} : memref<1x1x32xf32, #tpu.memory_space<vmem>>, vector<1x1x32xf32>,
      %cst_22 = arith.constant 0.000000e+00 : f32
      %21 = vector.broadcast %cst_22 : f32 to vector<1x1x32xf32>
      %c0_23 = arith.constant 0 : index
      %c0_24 = arith.constant 0 : index
      %c0_25 = arith.constant 0 : index
      %22 = vector.load %arg5[%c0_23, %c0_24, %c0_25] : memref<1x1x32xf32, #tpu.memory_space<vmem>>, vector<1x1x32xf32>
      tpu.vector_store %arg5[%c0_23, %c0_24, %c0_25], %21 {strides = array<i32>} : memref<1x1x32xf32, #tpu.memory_space<vmem>>, vector<1x1x32xf32>,
    } else {
    }
    %c0 = arith.constant 0 : index
    %c0_1 = arith.constant 0 : index
    %3 = vector.load %arg2[%c0, %c0_1] : memref<8x32xf32, #tpu.memory_space<vmem>>, vector<8x32xf32>
    %c0_2 = arith.constant 0 : index
    %c0_3 = arith.constant 0 : index
    %4 = vector.load %arg3[%c0_2, %c0_3] : memref<32x32xf32, #tpu.memory_space<vmem>>, vector<32x32xf32>
    %cst = arith.constant dense<0.000000e+00> : vector<8x32xf32>
    %5 = tpu.matmul %3, %4, %cst {dimension_numbers = #tpu.dot_dimension_numbers<[1], [0], [0], [1], [0, 0, 1, 1], [], []>} : vector<8x32xf32>, vector<32x32xf32>, vector<8x32xf32> -> vector<8x32xf32>
    %c0_4 = arith.constant 0 : index
    %c0_5 = arith.constant 0 : index
    %c0_6 = arith.constant 0 : index
    %6 = vector.load %arg4[%c0_4, %c0_5, %c0_6] : memref<1x1x32xf32, #tpu.memory_space<vmem>>, vector<1x1x32xf32>
    %cst_7 = arith.constant dense<0.000000e+00> : vector<32xf32>
    %7 = vector.multi_reduction <add>, %5, %cst_7 [0] : vector<8x32xf32> to vector<32xf32>
    %8 = vector.shape_cast %7 : vector<32xf32> to vector<1x32xf32>
    %9 = vector.shape_cast %8 : vector<1x32xf32> to vector<1x1x32xf32>
    %10 = arith.addf %6, %9 : vector<1x1x32xf32>
    %c0_8 = arith.constant 0 : index
    %c0_9 = arith.constant 0 : index
    %c0_10 = arith.constant 0 : index
    %11 = vector.load %arg4[%c0_8, %c0_9, %c0_10] : memref<1x1x32xf32, #tpu.memory_space<vmem>>, vector<1x1x32xf32>
    tpu.vector_store %arg4[%c0_8, %c0_9, %c0_10], %10 {strides = array<i32>} : memref<1x1x32xf32, #tpu.memory_space<vmem>>, vector<1x1x32xf32>,
    %c0_11 = arith.constant 0 : index
    %c0_12 = arith.constant 0 : index
    %c0_13 = arith.constant 0 : index
    %12 = vector.load %arg5[%c0_11, %c0_12, %c0_13] : memref<1x1x32xf32, #tpu.memory_space<vmem>>, vector<1x1x32xf32>
    %13 = arith.mulf %5, %5 : vector<8x32xf32>
    %cst_14 = arith.constant dense<0.000000e+00> : vector<32xf32>
    %14 = vector.multi_reduction <add>, %13, %cst_14 [0] : vector<8x32xf32> to vector<32xf32>
    %15 = vector.shape_cast %14 : vector<32xf32> to vector<1x32xf32>
    %16 = vector.shape_cast %15 : vector<1x32xf32> to vector<1x1x32xf32>
    %17 = arith.addf %12, %16 : vector<1x1x32xf32>
    %c0_15 = arith.constant 0 : index
    %c0_16 = arith.constant 0 : index
    %c0_17 = arith.constant 0 : index
    %18 = vector.load %arg5[%c0_15, %c0_16, %c0_17] : memref<1x1x32xf32, #tpu.memory_space<vmem>>, vector<1x1x32xf32>
    tpu.vector_store %arg5[%c0_15, %c0_16, %c0_17], %17 {strides = array<i32>} : memref<1x1x32xf32, #tpu.memory_space<vmem>>, vector<1x1x32xf32>,
    return
  }
  func.func @transform_0(%arg0: i32, %arg1: i32) -> (i32, i32) {
    %c1_i32 = arith.constant 1 : i32
    %0 = arith.muli %arg0, %c1_i32 : i32
    %1 = arith.addi %0, %arg1 : i32
    %c0_i32 = arith.constant 0 : i32
    %c0_i32_0 = arith.constant 0 : i32
    return %1, %c0_i32 : i32, i32
  }
  func.func @transform_1(%arg0: i32, %arg1: i32) -> (i32, i32) {
    %c0_i32 = arith.constant 0 : i32
    %c0_i32_0 = arith.constant 0 : i32
    %c0_i32_1 = arith.constant 0 : i32
    return %c0_i32, %c0_i32_0 : i32, i32
  }
  func.func @transform_2(%arg0: i32, %arg1: i32) -> (i32, i32, i32) {
    %c0_i32 = arith.constant 0 : i32
    %c0_i32_0 = arith.constant 0 : i32
    %c0_i32_1 = arith.constant 0 : i32
    return %arg0, %c0_i32, %c0_i32_0 : i32, i32, i32
  }
  func.func @transform_3(%arg0: i32, %arg1: i32) -> (i32, i32, i32) {
    %c0_i32 = arith.constant 0 : i32
    %c0_i32_0 = arith.constant 0 : i32
    %c0_i32_1 = arith.constant 0 : i32
    return %arg0, %c0_i32, %c0_i32_0 : i32, i32, i32
  }
}

</mosaic_0001>

<bundles_post_ra>
// kernel: tpu_custom_call.1
= control target key start
LH: loop header
LB: loop body
LE: loop exit
PB: predicated region body
PF: predicated region fallthrough
CT: control target
= control target key end

     0   :  { %9 = vsyncpa [#allocation3], 0  ;;  %s407_s0 = inlined_call_operand.hbm [shape: f32[8,32], index: 0, kind: input, shape index: {}]   ;;  %s408_s1 = inlined_call_operand.hbm [shape: f32[32,32], index: 1, kind: input, shape index: {}]   ;;  %s409_s2 = inlined_call_operand.hbm [shape: f32[1,1,32], index: 2, kind: output, shape index: {0}]   ;;  %s410_s3 = inlined_call_operand.hbm [shape: f32[1,1,32], index: 3, kind: output, shape index: {1}]  }
   0x1   :  { %10 = vsyncpa [#allocation6], 0 }
   0x2   :  { %11 = vsyncpa [#allocation4], 0 }
   0x3   :  { %12 = vsyncpa [#allocation9], 0  ;;  %s311_s12 = smov [#allocation2]   ;;  %s312_s14 = smov [#allocation5]  }
   0x4   :  { %s22_s13 = sshll.u32 %s311_s12, 4  ;;  %s31_s15 = sshll.u32 %s312_s14, 4  ;;  %s23_s13 = int_to_ptr.vmem [resolvable:$true] %s22_s13  ;;  %s340_s15 = int_to_ptr.vmem [resolvable:$true] %s31_s15 }
   0x5   :  { %s215_s18 = scalar_lea.hbm %s407_s0, 128 }
   0x6   :  { %p216_p0 = scmp.ne.s32.totalorder %s407_s0, %s215_s18  ;;  %p219_p1 = scmp.lt.u32.totalorder %s215_s18, %s407_s0 }
   0x8   :  { %p221_p2 = pnand %p219_p1, %p216_p0 }
   0xa   :  { %224 = shalt.err (!%p221_p2)
}
   0xb   :  { %s225_s23 = scalar_lea.vmem %s23_s13, 128  ;;  %p230_p4 = scmp.lt.s32.totalorder %s23_s13, %s23_s13 }
   0xc   :  { %p226_p3 = scmp.ne.s32.totalorder %s23_s13, %s225_s23  ;;  %p231_p5 = scmp.lt.s32.totalorder %s225_s23, %s225_s23 }
   0xe   :  { %p232_p6 = por %p231_p5, %p230_p4 }
  0x10   :  { %p233_p7 = pnand %p232_p6, %p226_p3 }
  0x12   :  { %236 = shalt.err (!%p233_p7)
}
  0x13   :  { %25 = dma.hbm_to_vmem [thread:$0]  %s407_s0, 128, %s23_s13, [#allocation3]  }
  0x14   :  { %s237_s28 = scalar_lea.hbm %s408_s1, 512 }
  0x15   :  { %p238_p8 = scmp.ne.s32.totalorder %s408_s1, %s237_s28  ;;  %p241_p9 = scmp.lt.u32.totalorder %s237_s28, %s408_s1 }
  0x17   :  { %p243_p10 = pnand %p241_p9, %p238_p8 }
  0x19   :  { %246 = shalt.err (!%p243_p10)
}
  0x1a   :  { %s247_s6 = scalar_lea.vmem %s340_s15, 512  ;;  %p252_p12 = scmp.lt.s32.totalorder %s340_s15, %s340_s15 }
  0x1b   :  { %p248_p11 = scmp.ne.s32.totalorder %s340_s15, %s247_s6  ;;  %p253_p13 = scmp.lt.s32.totalorder %s247_s6, %s247_s6 }
  0x1d   :  { %p254_p0 = por %p253_p13, %p252_p12 }
  0x1f   :  { %p255_p1 = pnand %p254_p0, %p248_p11 }
  0x21   :  { %258 = shalt.err (!%p255_p1)
}
  0x22   :  { %s313_s0 = smov 128   ;;  %s314_s7 = smov 8  }
  0x23   :  { %37 = dma.hbm_to_vmem [thread:$0]  %s408_s1, 512, %s340_s15, [#allocation6], %s313_s0, %s313_s0, %s314_s7  }
  0x24   :  { %303 = dma.done.wait [#allocation3], 128  }
  0x25   :  { %304 = vsyncadd [#allocation3], 4294967168 }
  0x26   :  { %305 = dma.done.wait [#allocation6], 512  }
  0x27   :  { %306 = vsyncadd [#allocation6], 4294966784  ;;  %vm49_vm0 = vcmask 253952   ;;  %v315_v0 = vmov 0.0|0.0   ;;  %v316_v1 = vmov 0.0   ;;  %vm317_vm1 = vmmov 0  }
  0x28   :  { %200 = vmatprep.subr.bf16.mxu0 %v315_v0  ;;  %50 = vst.msk [vmem:[#allocation7] sm:$0x1] %vm49_vm0, %v316_v1  ;;  %51 = vst.msk [vmem:[#allocation8] sm:$0x1] %vm49_vm0, %v316_v1  ;;  %197 = vmatprep.mubr.msk.f32.mxu0 %vm317_vm1, %v316_v1  ;;  %v53_v2 = vld [vmem:[#allocation5] sm:$0xff]  ;;  %v54_v3 = vld [vmem:[#allocation5 + $0x8] sm:$0xff] }
  0x29   :  { %v55_v4 = vld [vmem:[#allocation5 + $0x10] sm:$0xff]  ;;  %v201_v5 = vpack.c.bf16 %v54_v3, %v53_v2  ;;  %v56_v6 = vld [vmem:[#allocation5 + $0x18] sm:$0xff]  ;;  %vm57_vm2 = vcmask 261120   ;;  %s318_s1 = smov [#allocation7]   ;;  %s319_s11 = smov [#allocation8]  }
  0x2a   :  { %v204_v7 = vpack.c.bf16 %v56_v6, %v55_v4  ;;  %v52_v8 = vld [vmem:[#allocation2] sm:$0xff]  ;;  %s159_s10 = sshll.u32 %s318_s1, 4  ;;  %s169_s12 = sshll.u32 %s319_s11, 4  ;;  %s160_s10 = int_to_ptr.vmem [resolvable:$true] %s159_s10  ;;  %s374_s12 = int_to_ptr.vmem [resolvable:$true] %s169_s12 }
  0x2b   :  { %202 = vmatpush3.bf16.msra.mxu0 %v201_v5  ;;  %s259_s13 = scalar_lea.vmem %s160_s10, 16  ;;  %s263_s14 = scalar_lea.vmem %s160_s10, 32 }
  0x2c   :  { %203 = vmatprep.subr.bf16.mxu0 %v315_v0  ;;  %p260_p2 = scmp.ne.s32.totalorder %s160_s10, %s259_s13  ;;  %p264_p3 = scmp.lt.s32.totalorder %s160_s10, %s160_s10 }
  0x2d   :  { %p265_p4 = scmp.lt.s32.totalorder %s263_s14, %s259_s13 }
  0x2f   :  { %205 = vmatpush3.bf16.msra.mxu0 %v204_v7  ;;  %v131_v23 = vld [vmem:[#allocation7] sm:$0x1]  ;;  %v142_v26 = vld [vmem:[#allocation8] sm:$0x1]  ;;  %p266_p5 = por %p265_p4, %p264_p3 }
  0x31   :  { %p267_p6 = pnand %p266_p5, %p260_p2 }
  0x32   :  { %198 = vmatmul.mubr.msk.f32.vlgmr.msra.gmra.mrb[0].mxu0 %vm57_vm2, %v52_v8 }
 0x105   :  { %v127_v9 = vpop.f32.mrb[0].mxu0 }
 0x106   :  { %v132_v10 = vsel %vm57_vm2, %v127_v9, 0.0  ;;  %v143_v11 = vmul.f32 %v127_v9, %v127_v9  ;;  %v199_v12 = vpop.f32.mrb[1].mxu0 }
 0x107   :  { %v133_v13 = vrot.slane %v132_v10, 4 }
 0x108   :  { %v144_v14 = vsel %vm57_vm2, %v143_v11, 0.0 }
 0x109   :  { %v134_v15 = vadd.f32 %v133_v13, %v132_v10  ;;  %v145_v16 = vrot.slane %v144_v14, 4 }
 0x10b   :  { %v135_v17 = vrot.slane %v134_v15, 2  ;;  %v146_v18 = vadd.f32 %v145_v16, %v144_v14 }
 0x10d   :  { %v136_v19 = vadd.f32 %v135_v17, %v134_v15  ;;  %v147_v20 = vrot.slane %v146_v18, 2 }
 0x10f   :  { %v137_v21 = vrot.slane %v136_v19, 1  ;;  %v148_v22 = vadd.f32 %v147_v20, %v146_v18 }
 0x111   :  { %v138_v24 = vadd.f32 %v137_v21, %v136_v19  ;;  %v149_v25 = vrot.slane %v148_v22, 1 }
 0x113   :  { %v150_v27 = vadd.f32 %v149_v25, %v148_v22  ;;  %v139_v28 = vadd.f32 %v138_v24, %v131_v23 }
 0x115   :  { %141 = vst.msk [vmem:[#allocation7] sm:$0x1] %vm49_vm0, %v139_v28  ;;  %v151_v29 = vadd.f32 %v150_v27, %v142_v26 }
 0x116   :  { %270 = shalt.err (!%p267_p6)
}
 0x117   :  { %s271_s17 = scalar_lea.hbm %s409_s2, 16 }
 0x118   :  { %p272_p7 = scmp.ne.s32.totalorder %s409_s2, %s271_s17  ;;  %p275_p8 = scmp.lt.u32.totalorder %s271_s17, %s409_s2 }
 0x11a   :  { %p277_p9 = pnand %p275_p8, %p272_p7 }
 0x11c   :  { %280 = shalt.err (!%p277_p9)
}
 0x11d   :  { %162 = dma.vmem_to_hbm [thread:$0]  %s160_s10, 16, %s409_s2, [#allocation4]   ;;  %152 = vst.msk [vmem:[#allocation8] sm:$0x1] %vm49_vm0, %v151_v29 }
 0x11e   :  { %s281_s24 = scalar_lea.vmem %s374_s12, 16  ;;  %s285_s25 = scalar_lea.vmem %s374_s12, 32 }
 0x11f   :  { %p282_p10 = scmp.ne.s32.totalorder %s374_s12, %s281_s24  ;;  %p286_p11 = scmp.lt.s32.totalorder %s374_s12, %s374_s12 }
 0x120   :  { %p287_p12 = scmp.lt.s32.totalorder %s285_s25, %s281_s24 }
 0x122   :  { %p288_p13 = por %p287_p12, %p286_p11 }
 0x124   :  { %p289_p0 = pnand %p288_p13, %p282_p10 }
 0x126   :  { %292 = shalt.err (!%p289_p0)
}
 0x127   :  { %s293_s28 = scalar_lea.hbm %s410_s3, 16 }
 0x128   :  { %p294_p1 = scmp.ne.s32.totalorder %s410_s3, %s293_s28  ;;  %p297_p2 = scmp.lt.u32.totalorder %s293_s28, %s410_s3 }
 0x12a   :  { %p299_p3 = pnand %p297_p2, %p294_p1 }
 0x12c   :  { %302 = shalt.err (!%p299_p3)
}
 0x12d   :  { %172 = dma.vmem_to_hbm [thread:$0]  %s374_s12, 16, %s410_s3, [#allocation9]  }
 0x12e   :  { %307 = dma.done.wait [#allocation4], 16  }
 0x12f   :  { %308 = vsyncadd [#allocation4], 4294967280 }
 0x130   :  { %309 = dma.done.wait [#allocation9], 16  }
 0x131   :  { %310 = vsyncadd [#allocation9], 4294967280 }
 0x132   :  { %179 = vsyncpa [#allocation3], 1 }
 0x133   :  { %180 = vsyncpa [#allocation6], 1 }
 0x134   :  { %181 = vsyncpa [#allocation4], 1 }
 0x135   :  { %182 = vsyncpa [#allocation9], 1 }

</bundles_post_ra>
